<compile_context>
chip_gen: v7x
topology: tpu7x:2x2x1
jax: 0.10.0
libtpu: 0.0.40
codegen_flags: <defaults>
</compile_context>

<pallas_src>
import jax
import jax.numpy as jnp
from jax.experimental import pallas as pl
from jax.experimental.pallas import tpu as pltpu


def classifier_kernel(x_ref, mask_ref, w_ref, b_ref, out_ref):
    """One grid step handles a tile of TILE_M flattened (batch*sentence) rows.

    x_ref:    [TILE_M, H]  VMEM tile of the input rows
    mask_ref: [TILE_M, 1]  VMEM tile of mask_clss rows (f32)
    w_ref:    [1, H]       VMEM, resident f32 weight row (same block each step)
    b_ref:    [1]          SMEM scalar bias (f32)
    out_ref:  [TILE_M, 1]  VMEM tile of sent_scores rows
    """
    x = x_ref[...].astype(jnp.float32)                         # [TM, H]
    w = w_ref[...]                                             # [1, H] f32
    # Linear(H, 1): contract last axis with VPU mul + lane reduce (XLU).
    h = jnp.sum(x * w, axis=1, keepdims=True) + b_ref[0]       # [TM, 1] f32
    # sigmoid (EUP) then mask (VPU elementwise).
    scores = jax.nn.sigmoid(h) * mask_ref[...]
    out_ref[...] = scores.astype(out_ref.dtype)


def _pick_tile_m(num_rows, hidden, itemsize):
    # ~2 MiB of x per tile in its native dtype; with double-buffering plus the
    # in-kernel f32 copy / mul-reduce intermediate this stays well under the
    # v5e 16 MiB scoped default and v7x's 64 MiB/TC physical VMEM.
    budget_bytes = 2 << 20
    t = budget_bytes // max(1, hidden * itemsize)
    if t >= num_rows:
        return num_rows                 # single tile: block == full array dim
    t = min(t, 1024)                    # cap per-step intermediate size
    return max(8, (t // 8) * 8)         # multiple of 8 (sublane granularity)


def classifier_forward(x, weight, bias, mask_clss, tile_m=None):
    """x: [B, S, H], weight: [1, H], bias: [1], mask_clss: [B, S] -> [B, S]."""
    B, S, H = x.shape
    R = B * S

    x2 = x.reshape(R, H)                              # bitcast reshape, no copy
    mask2 = mask_clss.reshape(R, 1).astype(jnp.float32)
    w2 = weight.reshape(1, H).astype(jnp.float32)     # resident, pre-cast once
    b1 = bias.reshape(1).astype(jnp.float32)

    if tile_m is None:
        tile_m = _pick_tile_m(R, H, jnp.dtype(x.dtype).itemsize)
    grid = (pl.cdiv(R, tile_m),)

    out2 = pl.pallas_call(
        classifier_kernel,
        out_shape=jax.ShapeDtypeStruct((R, 1), x.dtype),
        grid=grid,
        in_specs=[
            pl.BlockSpec((tile_m, H), lambda i: (i, 0)),        # x row tile
            pl.BlockSpec((tile_m, 1), lambda i: (i, 0)),        # mask row tile
            pl.BlockSpec((1, H), lambda i: (0, 0)),             # weight: resident
            pl.BlockSpec(memory_space=pltpu.MemorySpace.SMEM),  # bias scalar
        ],
        out_specs=pl.BlockSpec((tile_m, 1), lambda i: (i, 0)),
        compiler_params=pltpu.CompilerParams(
            dimension_semantics=("parallel",),   # rows independent -> megacore shard
            vmem_limit_bytes=32 << 20,           # headroom on all chips (<=64 MiB v7x)
        ),
    )(x2, mask2, w2, b1)

    return out2.reshape(B, S)


if __name__ == "__main__":
    B, S, H = 2, 8, 32  # batch, num_sentences (seq), hidden_size

    key = jax.random.PRNGKey(0)
    kx, kw, kb, km = jax.random.split(key, 4)

    x = jax.random.normal(kx, (B, S, H), dtype=jnp.float32)
    # Deterministic synthetic parameters (nn.Linear(H, 1)-shaped).
    weight = jax.random.normal(kw, (1, H), dtype=jnp.float32) * (1.0 / jnp.sqrt(H))
    bias = jax.random.normal(kb, (1,), dtype=jnp.float32) * 0.1
    # mask_clss: 0/1 float mask over sentence positions.
    mask_clss = (jax.random.uniform(km, (B, S)) > 0.3).astype(jnp.float32)

    # Pure-JAX reference.
    ref = jax.nn.sigmoid(jnp.einsum("bsh,h->bs", x, weight[0]) + bias[0]) * mask_clss

    # Auto-picked tile (single grid step at this size).
    out = jax.block_until_ready(classifier_forward(x, weight, bias, mask_clss))
    assert out.shape == (B, S)
    assert jnp.allclose(out, ref, atol=1e-5, rtol=1e-5), "mismatch vs reference"

    # Also exercise the multi-tile grid path (tiled rows, resident weight).
    out_tiled = jax.block_until_ready(
        classifier_forward(x, weight, bias, mask_clss, tile_m=8))
    assert jnp.allclose(out_tiled, ref, atol=1e-5, rtol=1e-5), "mismatch (tiled)"

    print("KERNEL_OK")
</pallas_src>

<mosaic_0001>
module attributes {stable_mosaic.version = 11 : i64} {
  func.func @classifier_kernel(%arg0: i32, %arg1: memref<16x32xf32, #tpu.memory_space<vmem>>, %arg2: memref<16x1xf32, #tpu.memory_space<vmem>>, %arg3: memref<1x32xf32, #tpu.memory_space<vmem>>, %arg4: memref<1xf32, #tpu.memory_space<smem>>, %arg5: memref<16x1xf32, #tpu.memory_space<vmem>>) attributes {dimension_semantics = [#tpu.dimension_semantics<parallel>], iteration_bounds = array<i64: 1>, scalar_prefetch = 0 : i64, scratch_operands = 0 : i64, tpu.core_type = #tpu.core_type<tc>, window_params = [{transform_indices = @transform_0, window_bounds = array<i64: 16, 32>}, {transform_indices = @transform_1, window_bounds = array<i64: 16, 1>}, {pipeline_mode = #tpu.pipeline_mode<synchronous>, transform_indices = @transform_2, window_bounds = array<i64: 1, 32>}, {transform_indices = @transform_3, window_bounds = array<i64: 1>}, {transform_indices = @transform_4, window_bounds = array<i64: 16, 1>}]} {
    %c0 = arith.constant 0 : index
    %c0_0 = arith.constant 0 : index
    %0 = vector.load %arg1[%c0, %c0_0] : memref<16x32xf32, #tpu.memory_space<vmem>>, vector<16x32xf32>
    %c0_1 = arith.constant 0 : index
    %c0_2 = arith.constant 0 : index
    %1 = vector.load %arg3[%c0_1, %c0_2] : memref<1x32xf32, #tpu.memory_space<vmem>>, vector<1x32xf32>
    %2 = vector.broadcast %1 : vector<1x32xf32> to vector<16x32xf32>
    %3 = arith.mulf %0, %2 : vector<16x32xf32>
    %cst = arith.constant dense<0.000000e+00> : vector<16xf32>
    %4 = vector.multi_reduction <add>, %3, %cst [1] : vector<16x32xf32> to vector<16xf32>
    %5 = vector.shape_cast %4 : vector<16xf32> to vector<16x1xf32>
    %c0_3 = arith.constant 0 : index
    %6 = memref.load %arg4[%c0_3] : memref<1xf32, #tpu.memory_space<smem>>
    %7 = vector.broadcast %6 : f32 to vector<16x1xf32>
    %8 = arith.addf %5, %7 : vector<16x1xf32>
    %9 = arith.negf %8 : vector<16x1xf32>
    %10 = math.exp %9 : vector<16x1xf32>
    %cst_4 = arith.constant 1.000000e+00 : f32
    %11 = vector.broadcast %cst_4 : f32 to vector<16x1xf32>
    %12 = arith.addf %11, %10 : vector<16x1xf32>
    %13 = arith.divf %11, %12 : vector<16x1xf32>
    %c0_5 = arith.constant 0 : index
    %c0_6 = arith.constant 0 : index
    %14 = vector.load %arg2[%c0_5, %c0_6] : memref<16x1xf32, #tpu.memory_space<vmem>>, vector<16x1xf32>
    %15 = arith.mulf %13, %14 : vector<16x1xf32>
    %c0_7 = arith.constant 0 : index
    %c0_8 = arith.constant 0 : index
    %16 = vector.load %arg5[%c0_7, %c0_8] : memref<16x1xf32, #tpu.memory_space<vmem>>, vector<16x1xf32>
    tpu.vector_store %arg5[%c0_7, %c0_8], %15 {strides = array<i32>} : memref<16x1xf32, #tpu.memory_space<vmem>>, vector<16x1xf32>,
    return
  }
  func.func @transform_0(%arg0: i32) -> (i32, i32) {
    %c0_i32 = arith.constant 0 : i32
    %c0_i32_0 = arith.constant 0 : i32
    return %arg0, %c0_i32 : i32, i32
  }
  func.func @transform_1(%arg0: i32) -> (i32, i32) {
    %c0_i32 = arith.constant 0 : i32
    %c0_i32_0 = arith.constant 0 : i32
    return %arg0, %c0_i32 : i32, i32
  }
  func.func @transform_2(%arg0: i32) -> (i32, i32) {
    %c0_i32 = arith.constant 0 : i32
    %c0_i32_0 = arith.constant 0 : i32
    %c0_i32_1 = arith.constant 0 : i32
    return %c0_i32, %c0_i32_0 : i32, i32
  }
  func.func @transform_3(%arg0: i32) -> i32 {
    %c0_i32 = arith.constant 0 : i32
    %c0_i32_0 = arith.constant 0 : i32
    return %c0_i32 : i32
  }
  func.func @transform_4(%arg0: i32) -> (i32, i32) {
    %c0_i32 = arith.constant 0 : i32
    %c0_i32_0 = arith.constant 0 : i32
    return %arg0, %c0_i32 : i32, i32
  }
}

</mosaic_0001>

<bundles_post_ra>
// kernel: tpu_custom_call.1
= control target key start
LH: loop header
LB: loop body
LE: loop exit
PB: predicated region body
PF: predicated region fallthrough
CT: control target
= control target key end

     0   :  { %vm29_vm0 = vcmask 261120   ;;  %vm56_vm1 = vcmask 7168   ;;  %s123_s0 = inlined_call_operand.vmem [shape: f32[16,32], index: 0, kind: input, shape index: {}]   ;;  %s124_s2 = inlined_call_operand.vmem [shape: f32[1,32], index: 2, kind: input, shape index: {}]   ;;  %s125_s3 = inlined_call_operand.<no memory space> [shape: f32[1], index: 3, kind: input, shape index: {}]   ;;  %s126_s1 = inlined_call_operand.vmem [shape: f32[16,1], index: 1, kind: input, shape index: {}]   ;;  %s127_s4 = inlined_call_operand.vmem [shape: f32[16,1], index: 4, kind: output, shape index: {}]  }
   0x1   :  { %v18_v0 = vld [vmem:[%s123_s0] sm:$0xff]  ;;  %v19_v2 = vld [vmem:[%s123_s0 + $0x8] sm:$0xff]  ;;  %v37_v7 = vstv %s125_s3 }
   0x2   :  { %v63_v1 = vld [vmem:[%s124_s2] ss:$0 sm:$0xff]  ;;  %v53_v21 = vld [vmem:[%s126_s1 + $0x8] sm:$0xff] }
   0x3   :  { %v27_v3 = vmul.f32 %v63_v1, %v18_v0  ;;  %v28_v4 = vmul.f32 %v63_v1, %v19_v2  ;;  %v52_v18 = vld [vmem:[%s126_s1] sm:$0xff] }
   0x5   :  { %v30_v5 = vsel %vm29_vm0, %v27_v3, 0.0  ;;  %v33_v6 = vsel %vm29_vm0, %v28_v4, 0.0 }
   0x6   :  { %31 = vadd.xlane.f32.xlu0 %v30_v5 }
   0xa   :  { %34 = vadd.xlane.f32.xlu0 %v33_v6 }
  0x93   :  { %v32_v8 = vpop.xlane.xlu0 %31 }
  0x94   :  { %v38_v9 = vadd.f32 %v37_v7, %v32_v8 }
  0x96   :  { %v64_v10 = vmul.f32 -1.442695, %v38_v9 }
  0x97   :  { %v35_v11 = vpop.xlane.xlu0 %34 }
  0x98   :  { %66 = vpow2.f32 %v64_v10  ;;  %v39_v12 = vadd.f32 %v37_v7, %v35_v11 }
  0x9a   :  { %v65_v13 = vmul.f32 -1.442695, %v39_v12 }
  0x9c   :  { %68 = vpow2.f32 %v65_v13 }
  0xa2   :  { %v67_v14 = vpop.eup %66 }
  0xa3   :  { %v46_v15 = vadd.f32 1.0, %v67_v14 }
  0xa5   :  { %70 = vrcp.f32 %v46_v15 }
  0xa6   :  { %v69_v16 = vpop.eup %68 }
  0xa7   :  { %v47_v17 = vadd.f32 1.0, %v69_v16 }
  0xa9   :  { %72 = vrcp.f32 %v47_v17 }
  0xaf   :  { %v71_v19 = vpop.eup %70 }
  0xb0   :  { %v54_v20 = vmul.f32 %v71_v19, %v52_v18 }
  0xb2   :  { %57 = vst.msk [vmem:[%s127_s4] sm:$0xff] %vm56_vm1, %v54_v20 }
  0xb3   :  { %v73_v22 = vpop.eup %72 }
  0xb4   :  { %v55_v23 = vmul.f32 %v73_v22, %v53_v21 }
  0xb6   :  { %58 = vst.msk [vmem:[%s127_s4 + $0x8] sm:$0xff] %vm56_vm1, %v55_v23 }

</bundles_post_ra>
